<compile_context>
chip_gen: v5e
topology: v5e:2x2
jax: 0.10.0
libtpu: 0.0.40
codegen_flags: <defaults>
</compile_context>

<pallas_src>
from functools import partial
from typing import List, Tuple

import jax
import jax.numpy as jnp
from jax.experimental import pallas as pl
from jax.experimental.pallas import tpu as pltpu

LANE = 128
SUBLANE = 8


def _round_up(n: int, m: int) -> int:
    return ((n + m - 1) // m) * m


def _mlp_q_kernel(x_ref, w1_ref, b1_ref, w2_ref, b2_ref, q_ref):
    # Fused: q = relu(x @ W1 + b1) @ W2 + b2
    # x/W1/W2 are bf16 (MXU-native); accumulation + biases are f32.
    x = x_ref[...]
    h = jnp.dot(x, w1_ref[...], preferred_element_type=jnp.float32) + b1_ref[...]
    h = jnp.maximum(h, 0.0)
    q = (jnp.dot(h.astype(jnp.bfloat16), w2_ref[...],
                 preferred_element_type=jnp.float32)
         + b2_ref[...])
    q_ref[...] = q.astype(q_ref.dtype)


@partial(jax.jit, static_argnames=("num_actions", "tile_b"))
def dqn_q_values(x, w1p, b1p, w2p, b2p, *, num_actions: int, tile_b: int = 512):
    """Pallas-backed inner model: per-action Q-values (batch, num_actions).

    x:   (batch, state_dim) float32
    w1p: (state_dim, hid_pad)  bfloat16   (hidden zero-padded to a multiple of 128)
    b1p: (1, hid_pad)          float32
    w2p: (hid_pad, na_pad)     bfloat16   (num_actions zero-padded to a multiple of 128)
    b2p: (1, na_pad)           float32
    """
    batch, state_dim = x.shape
    hid_pad = w1p.shape[1]
    na_pad = w2p.shape[1]

    # Batch tiling: shrink the tile for small batches, pad batch to a multiple of it.
    tile_b = max(SUBLANE, min(tile_b, _round_up(batch, SUBLANE)))
    batch_pad = _round_up(batch, tile_b)

    xb = x.astype(jnp.bfloat16)
    if batch_pad != batch:
        xb = jnp.pad(xb, ((0, batch_pad - batch), (0, 0)))

    grid = (batch_pad // tile_b,)
    const2 = lambda i: (0, 0)  # weights/biases resident across all batch tiles

    q_pad = pl.pallas_call(
        _mlp_q_kernel,
        out_shape=jax.ShapeDtypeStruct((batch_pad, na_pad), jnp.float32),
        grid=grid,
        in_specs=[
            pl.BlockSpec((tile_b, state_dim), lambda i: (i, 0)),   # x: streamed per tile
            pl.BlockSpec((state_dim, hid_pad), const2),            # W1: resident
            pl.BlockSpec((1, hid_pad), const2),                    # b1: resident
            pl.BlockSpec((hid_pad, na_pad), const2),                # W2: resident
            pl.BlockSpec((1, na_pad), const2),                      # b2: resident
        ],
        out_specs=pl.BlockSpec((tile_b, na_pad), lambda i: (i, 0)),
        compiler_params=pltpu.CompilerParams(
            dimension_semantics=("parallel",),  # shard batch tiles across TCs (v7x)
        ),
    )(xb, w1p, b1p, w2p, b2p)

    # Slice off batch padding and lane padding before returning to the caller.
    return q_pad[:batch, :num_actions]


class OSSPredictorUnwrapper:
    """JAX/Pallas analogue of reagent.prediction.predictor_wrapper.OSSPredictorUnwrapper.

    forward(*args, **kwargs) -> Tuple[List[str], jnp.ndarray], delegated to the
    wrapped model unchanged (pure pass-through, exactly like the PyTorch module).
    """

    def __init__(self, model) -> None:
        self.model = model

    def forward(self, *args, **kwargs) -> Tuple[List[str], jnp.ndarray]:
        return self.model(*args, **kwargs)

    __call__ = forward


class _PallasDqnPredictor:
    """Minimal wrapped model: state features -> (action_names, Q-values).

    Weight padding / bf16 casting is done once here, not per forward call.
    """

    def __init__(self, state_dim: int, hidden_dim: int, num_actions: int, key) -> None:
        k1, k2, k3, k4 = jax.random.split(key, 4)
        # Deterministic synthetic params (no checkpoint load).
        self.w1 = (jax.random.normal(k1, (state_dim, hidden_dim), jnp.float32)
                   / jnp.sqrt(jnp.float32(state_dim)))
        self.b1 = 0.01 * jax.random.normal(k2, (1, hidden_dim), jnp.float32)
        self.w2 = (jax.random.normal(k3, (hidden_dim, num_actions), jnp.float32)
                   / jnp.sqrt(jnp.float32(hidden_dim)))
        self.b2 = 0.01 * jax.random.normal(k4, (1, num_actions), jnp.float32)
        self.num_actions = num_actions
        self.action_names: List[str] = [f"action_{i}" for i in range(num_actions)]

        # Lane-dense / MXU-aligned padded parameter copies (padding is zero, so it
        # contributes nothing numerically).  Done once at construction.
        hid_pad = _round_up(hidden_dim, LANE)
        na_pad = _round_up(num_actions, LANE)
        self.w1p = (jnp.zeros((state_dim, hid_pad), jnp.bfloat16)
                    .at[:, :hidden_dim].set(self.w1.astype(jnp.bfloat16)))
        self.b1p = (jnp.zeros((1, hid_pad), jnp.float32)
                    .at[:, :hidden_dim].set(self.b1))
        self.w2p = (jnp.zeros((hid_pad, na_pad), jnp.bfloat16)
                    .at[:hidden_dim, :num_actions].set(self.w2.astype(jnp.bfloat16)))
        self.b2p = (jnp.zeros((1, na_pad), jnp.float32)
                    .at[:, :num_actions].set(self.b2))

    def __call__(self, state_features) -> Tuple[List[str], jnp.ndarray]:
        q = dqn_q_values(state_features, self.w1p, self.b1p, self.w2p, self.b2p,
                         num_actions=self.num_actions)
        # TODO(synk): action-name List[str] is host-side Python metadata; it has no
        # device/Pallas representation and is passed through unchanged.
        return self.action_names, q


if __name__ == "__main__":
    key = jax.random.PRNGKey(0)
    k_param, k_x = jax.random.split(key)

    batch, state_dim, hidden_dim, num_actions = 8, 32, 64, 4
    model = _PallasDqnPredictor(state_dim, hidden_dim, num_actions, k_param)
    unwrapper = OSSPredictorUnwrapper(model)

    x = jax.random.normal(k_x, (batch, state_dim), jnp.float32)

    action_names, q_values = unwrapper(x)
    q_values = jax.block_until_ready(q_values)

    # Plain-JAX reference with the same bf16-input / f32-accumulation recipe.
    xb = x.astype(jnp.bfloat16)
    w1b = model.w1.astype(jnp.bfloat16)
    w2b = model.w2.astype(jnp.bfloat16)
    h_ref = jnp.maximum(
        jnp.dot(xb, w1b, preferred_element_type=jnp.float32) + model.b1, 0.0)
    q_ref = (jnp.dot(h_ref.astype(jnp.bfloat16), w2b,
                     preferred_element_type=jnp.float32) + model.b2)

    assert q_values.shape == (batch, num_actions)
    assert isinstance(action_names, list) and len(action_names) == num_actions
    assert jnp.allclose(q_values, q_ref, atol=1e-3, rtol=1e-3)

    # Also exercise a larger, ragged batch to cover the tiled/padded path.
    big_batch = 1000
    xb_big = jax.random.normal(jax.random.PRNGKey(1), (big_batch, state_dim), jnp.float32)
    _, q_big = unwrapper(xb_big)
    q_big = jax.block_until_ready(q_big)
    assert q_big.shape == (big_batch, num_actions)

    print("KERNEL_OK")
</pallas_src>

<mosaic_0001>
module attributes {stable_mosaic.version = 11 : i64} {
  func.func @_mlp_q_kernel(%arg0: i32, %arg1: memref<8x32xbf16, #tpu.memory_space<vmem>>, %arg2: memref<32x128xbf16, #tpu.memory_space<vmem>>, %arg3: memref<1x128xf32, #tpu.memory_space<vmem>>, %arg4: memref<128x128xbf16, #tpu.memory_space<vmem>>, %arg5: memref<1x128xf32, #tpu.memory_space<vmem>>, %arg6: memref<8x128xf32, #tpu.memory_space<vmem>>) attributes {dimension_semantics = [#tpu.dimension_semantics<parallel>], iteration_bounds = array<i64: 1>, scalar_prefetch = 0 : i64, scratch_operands = 0 : i64, tpu.core_type = #tpu.core_type<tc>, window_params = [{transform_indices = @transform_0, window_bounds = array<i64: 8, 32>}, {pipeline_mode = #tpu.pipeline_mode<synchronous>, transform_indices = @transform_1, window_bounds = array<i64: 32, 128>}, {pipeline_mode = #tpu.pipeline_mode<synchronous>, transform_indices = @transform_2, window_bounds = array<i64: 1, 128>}, {pipeline_mode = #tpu.pipeline_mode<synchronous>, transform_indices = @transform_3, window_bounds = array<i64: 128, 128>}, {pipeline_mode = #tpu.pipeline_mode<synchronous>, transform_indices = @transform_4, window_bounds = array<i64: 1, 128>}, {transform_indices = @transform_5, window_bounds = array<i64: 8, 128>}]} {
    %c0 = arith.constant 0 : index
    %c0_0 = arith.constant 0 : index
    %0 = vector.load %arg1[%c0, %c0_0] : memref<8x32xbf16, #tpu.memory_space<vmem>>, vector<8x32xbf16>
    %c0_1 = arith.constant 0 : index
    %c0_2 = arith.constant 0 : index
    %1 = vector.load %arg2[%c0_1, %c0_2] : memref<32x128xbf16, #tpu.memory_space<vmem>>, vector<32x128xbf16>
    %cst = arith.constant dense<0.000000e+00> : vector<8x128xf32>
    %2 = tpu.matmul %0, %1, %cst {dimension_numbers = #tpu.dot_dimension_numbers<[1], [0], [0], [1], [0, 0, 1, 1], [], []>} : vector<8x32xbf16>, vector<32x128xbf16>, vector<8x128xf32> -> vector<8x128xf32>
    %c0_3 = arith.constant 0 : index
    %c0_4 = arith.constant 0 : index
    %3 = vector.load %arg3[%c0_3, %c0_4] : memref<1x128xf32, #tpu.memory_space<vmem>>, vector<1x128xf32>
    %4 = vector.broadcast %3 : vector<1x128xf32> to vector<8x128xf32>
    %5 = arith.addf %2, %4 : vector<8x128xf32>
    %cst_5 = arith.constant 0.000000e+00 : f32
    %6 = vector.broadcast %cst_5 : f32 to vector<8x128xf32>
    %7 = arith.maximumf %5, %6 : vector<8x128xf32>
    %8 = arith.truncf %7 : vector<8x128xf32> to vector<8x128xbf16>
    %c0_6 = arith.constant 0 : index
    %c0_7 = arith.constant 0 : index
    %9 = vector.load %arg4[%c0_6, %c0_7] : memref<128x128xbf16, #tpu.memory_space<vmem>>, vector<128x128xbf16>
    %cst_8 = arith.constant dense<0.000000e+00> : vector<8x128xf32>
    %10 = tpu.matmul %8, %9, %cst_8 {dimension_numbers = #tpu.dot_dimension_numbers<[1], [0], [0], [1], [0, 0, 1, 1], [], []>} : vector<8x128xbf16>, vector<128x128xbf16>, vector<8x128xf32> -> vector<8x128xf32>
    %c0_9 = arith.constant 0 : index
    %c0_10 = arith.constant 0 : index
    %11 = vector.load %arg5[%c0_9, %c0_10] : memref<1x128xf32, #tpu.memory_space<vmem>>, vector<1x128xf32>
    %12 = vector.broadcast %11 : vector<1x128xf32> to vector<8x128xf32>
    %13 = arith.addf %10, %12 : vector<8x128xf32>
    %c0_11 = arith.constant 0 : index
    %c0_12 = arith.constant 0 : index
    %14 = vector.load %arg6[%c0_11, %c0_12] : memref<8x128xf32, #tpu.memory_space<vmem>>, vector<8x128xf32>
    tpu.vector_store %arg6[%c0_11, %c0_12], %13 {strides = array<i32>} : memref<8x128xf32, #tpu.memory_space<vmem>>, vector<8x128xf32>,
    return
  }
  func.func @transform_0(%arg0: i32) -> (i32, i32) {
    %c0_i32 = arith.constant 0 : i32
    %c0_i32_0 = arith.constant 0 : i32
    return %arg0, %c0_i32 : i32, i32
  }
  func.func @transform_1(%arg0: i32) -> (i32, i32) {
    %c0_i32 = arith.constant 0 : i32
    %c0_i32_0 = arith.constant 0 : i32
    %c0_i32_1 = arith.constant 0 : i32
    return %c0_i32, %c0_i32_0 : i32, i32
  }
  func.func @transform_2(%arg0: i32) -> (i32, i32) {
    %c0_i32 = arith.constant 0 : i32
    %c0_i32_0 = arith.constant 0 : i32
    %c0_i32_1 = arith.constant 0 : i32
    return %c0_i32, %c0_i32_0 : i32, i32
  }
  func.func @transform_3(%arg0: i32) -> (i32, i32) {
    %c0_i32 = arith.constant 0 : i32
    %c0_i32_0 = arith.constant 0 : i32
    %c0_i32_1 = arith.constant 0 : i32
    return %c0_i32, %c0_i32_0 : i32, i32
  }
  func.func @transform_4(%arg0: i32) -> (i32, i32) {
    %c0_i32 = arith.constant 0 : i32
    %c0_i32_0 = arith.constant 0 : i32
    %c0_i32_1 = arith.constant 0 : i32
    return %c0_i32, %c0_i32_0 : i32, i32
  }
  func.func @transform_5(%arg0: i32) -> (i32, i32) {
    %c0_i32 = arith.constant 0 : i32
    %c0_i32_0 = arith.constant 0 : i32
    return %arg0, %c0_i32 : i32, i32
  }
}

</mosaic_0001>

<bundles_post_ra>
// kernel: dqn_q_values.1
= control target key start
LH: loop header
LB: loop body
LE: loop exit
PB: predicated region body
PF: predicated region fallthrough
CT: control target
= control target key end

     0   :  { %10 = vsyncpa [#allocation3], 0  ;;  %s342_s0 = inlined_call_operand.vmem [shape: bf16[8,32], index: 0, kind: input, shape index: {}]   ;;  %s343_s1 = inlined_call_operand.hbm [shape: bf16[32,128], index: 1, kind: input, shape index: {}]   ;;  %s344_s2 = inlined_call_operand.vmem [shape: f32[1,128], index: 2, kind: input, shape index: {}]   ;;  %s345_s3 = inlined_call_operand.hbm [shape: bf16[128,128], index: 3, kind: input, shape index: {}]   ;;  %s346_s4 = inlined_call_operand.vmem [shape: f32[1,128], index: 4, kind: input, shape index: {}]   ;;  %s347_s5 = inlined_call_operand.vmem [shape: f32[8,128], index: 5, kind: output, shape index: {}]  }
   0x1   :  { %s18_s20 = sshll.u32 %s343_s1, 4  ;;  %s19_s20 = int_to_ptr.hbm [resolvable:$true] %s18_s20 }
   0x2   :  { %11 = vsyncpa [#allocation5], 0  ;;  %s290_s21 = smov [#allocation2]   ;;  %s33_s25 = sshll.u32 %s345_s3, 4  ;;  %s34_s25 = int_to_ptr.hbm [resolvable:$true] %s33_s25 }
   0x3   :  { %s20_s22 = sshll.u32 %s290_s21, 4  ;;  %s291_s26 = smov 64   ;;  %s21_s22 = int_to_ptr.vmem [resolvable:$true] %s20_s22 }
   0x4   :  { %s292_s27 = smov 4   ;;  %s293_s28 = smov [#allocation4]  }
   0x5   :  { %26 = dma.hbm_to_vmem [thread:$0]  %s19_s20, 256, %s21_s22, [#allocation3], %s291_s26, %s291_s26, %s292_s27  }
   0x6   :  { %s35_s29 = sshll.u32 %s293_s28, 4  ;;  %s36_s29 = int_to_ptr.vmem [resolvable:$true] %s35_s29 }
   0x7   :  { %41 = dma.hbm_to_vmem [thread:$0]  %s34_s25, 1024, %s36_s29, [#allocation5], %s291_s26, %s291_s26, %s292_s27  }
   0x8   :  { %286 = dma.done.wait [#allocation3], 256  }
   0x9   :  { %287 = vsyncadd [#allocation3], 4294967040 }
   0xa   :  { %288 = dma.done.wait [#allocation5], 1024  }
   0xb   :  { %289 = vsyncadd [#allocation5], 4294966272  ;;  %v223_v0 = vld [vmem:[#allocation2 + $0x8] sm:$0xff]  ;;  %v222_v2 = vld [vmem:[#allocation2] sm:$0xff]  ;;  %vm74_vm0 = vcmask 261120  }
   0xc   :  { %v231_v1 = vld [vmem:[#allocation4 + $0x38] sm:$0xff]  ;;  %84 = vmatpush.bf16.msra.mxu0 %v223_v0  ;;  %v230_v3 = vld [vmem:[#allocation4 + $0x30] sm:$0xff]  ;;  %v229_v5 = vld [vmem:[#allocation4 + $0x28] sm:$0xff] }
   0xd   :  { %161 = vmatpush.bf16.msra.mxu1 %v231_v1  ;;  %v53_v4 = vld [vmem:[%s342_s0] sm:$0xf]  ;;  %v228_v6 = vld [vmem:[#allocation4 + $0x20] sm:$0xff]  ;;  %v227_v7 = vld [vmem:[#allocation4 + $0x18] sm:$0xff] }
   0xe   :  { %v226_v8 = vld [vmem:[#allocation4 + $0x10] sm:$0xff]  ;;  %v225_v9 = vld [vmem:[#allocation4 + $0x8] sm:$0xff]  ;;  %v224_v10 = vld [vmem:[#allocation4] sm:$0xff] }
   0xf   :  { %v236_v11 = vld [vmem:[%s344_s2] ss:$0 sm:$0xff] }
  0x10   :  { %85 = vmatpush.bf16.msra.mxu0 %v222_v2  ;;  %v237_v17 = vld [vmem:[%s346_s4] ss:$0 sm:$0xff] }
  0x11   :  { %162 = vmatpush.bf16.msra.mxu1 %v230_v3 }
  0x13   :  { %189 = vmatmul.msk.bf16.vlgmr.msra.gmra.mxu0 %vm74_vm0, %v53_v4 }
  0x15   :  { %163 = vmatpush.bf16.msra.mxu1 %v229_v5 }
  0x19   :  { %164 = vmatpush.bf16.msra.mxu1 %v228_v6 }
  0x1d   :  { %165 = vmatpush.bf16.msra.mxu1 %v227_v7 }
  0x21   :  { %166 = vmatpush.bf16.msra.mxu1 %v226_v8 }
  0x25   :  { %167 = vmatpush.bf16.msra.mxu1 %v225_v9 }
  0x29   :  { %168 = vmatpush.bf16.msra.mxu1 %v224_v10 }
  0x90   :  { %v87_v12 = vpop.f32.mrf.mxu0 }
  0x91   :  { %v88_v13 = vadd.f32 %v236_v11, %v87_v12 }
  0x93   :  { %v91_v14 = vmax.f32 %v88_v13, 0.0 }
  0x95   :  { %v92_v15 = vpack.c.bf16 %v91_v14, %v91_v14 }
  0x97   :  { %169 = vmatmul.bf16.vlgmr.msra.gmra.mxu1 %v92_v15 }
  0x98   :  { %v89_v16 = vpop.f32.mrf.mxu0 }
 0x114   :  { %v170_v18 = vpop.f32.mrf.mxu1 }
 0x115   :  { %v171_v19 = vadd.f32 %v237_v17, %v170_v18 }
 0x117   :  { %174 = vst [vmem:[%s347_s5] sm:$0xff] %v171_v19 }
 0x11c   :  { %v172_v20 = vpop.f32.mrf.mxu1 }
 0x11d   :  { %179 = vsyncpa [#allocation3], 1 }
 0x11e   :  { %180 = vsyncpa [#allocation5], 1 }

</bundles_post_ra>
